<compile_context>
chip_gen: v7x
topology: tpu7x:2x2x1
jax: 0.10.0
libtpu: 0.0.40
codegen_flags: <defaults>
</compile_context>

<pallas_src>
import functools

import jax
import jax.numpy as jnp
from jax.experimental import pallas as pl
from jax.experimental.pallas import tpu as pltpu

EPS = 1e-5


def _round_up(x, m):
    return (x + m - 1) // m * m


def _ffn_kernel(x_ref, w1_ref, b1_ref, w2_ref, misc_ref, out_ref,
                acc_ref, xb_ref, *, tf, inv_e):
    """grid = (row_tiles, f_tiles); f is the reduction axis (innermost).

    acc_ref accumulates z = relu(x @ W1 + b1) @ W2 over hidden chunks in f32;
    on the last f step the second bias, residual and LayerNorm are applied.
    """
    f = pl.program_id(1)

    @pl.when(f == 0)
    def _():
        acc_ref[...] = jnp.zeros_like(acc_ref)
        # Hoisted cast: done once per row tile, not once per reduction step.
        xb_ref[...] = x_ref[...].astype(jnp.bfloat16)

    # b1 is fully resident; slice the current hidden chunk (tf is 128-aligned).
    start = pl.multiple_of(f * tf, 128)
    b1 = b1_ref[:, pl.ds(start, tf)]                         # (1, tf) f32

    h = jnp.dot(xb_ref[...], w1_ref[...],
                preferred_element_type=jnp.float32) + b1
    h = jnp.maximum(h, 0.0)                                  # ReLU (dropout = identity)
    acc_ref[...] += jnp.dot(h.astype(jnp.bfloat16), w2_ref[...],
                            preferred_element_type=jnp.float32)

    @pl.when(f == pl.num_programs(1) - 1)
    def _():
        b2 = misc_ref[0:1, :]                                # (1, Ep)
        gamma = misc_ref[1:2, :]
        beta = misc_ref[2:3, :]
        z = acc_ref[...] + b2 + x_ref[...].astype(jnp.float32)
        # LayerNorm over the *real* E features.  Padded columns of z are
        # exactly zero (padded W2 cols, b2, x, gamma, beta are all zero), so
        # plain sums divided by the real E give exact statistics.
        s1 = jnp.sum(z, axis=-1, keepdims=True)
        s2 = jnp.sum(z * z, axis=-1, keepdims=True)
        mu = s1 * inv_e
        var = s2 * inv_e - mu * mu
        out_ref[...] = ((z - mu) * jax.lax.rsqrt(var + EPS) * gamma + beta
                        ).astype(out_ref.dtype)


def pointwise_feed_forward(params, x, *, tile_m=None, tile_f=None):
    """x: (..., E).  Returns LayerNorm(FFN(x) + x), same shape and dtype."""
    orig_shape = x.shape
    out_dtype = x.dtype
    E = orig_shape[-1]
    F = params["w1_t"].shape[1]

    xf = x.reshape(-1, E)
    N = xf.shape[0]
    x_isz = jnp.dtype(xf.dtype).itemsize

    # --- per-generation VMEM budget -------------------------------------
    try:
        vmem_cap = int(pltpu.get_tpu_info().vmem_capacity_bytes)
    except Exception:  # pragma: no cover - conservative fallback (v7x-safe)
        vmem_cap = 64 << 20
    vmem_budget = (vmem_cap * 3) // 4          # ~48 MiB v7x, ~96 MiB v5e/v6e

    # --- lane-pad E, choose hidden tile tf and pad F ---------------------
    Ep = _round_up(E, 128)
    Fp_full = _round_up(F, 128)
    # Weights-resident fast path: double-buffered bf16 W1+W2 within half the
    # budget -> constant index_map, weights fetched exactly once.
    weights_full_bytes = 2 * 2 * (Ep * Fp_full * 2)
    if weights_full_bytes <= vmem_budget // 2:
        tf = Fp_full
    else:
        tgt = tile_f if tile_f is not None else 512
        tf = min(_round_up(max(tgt, 256), 256), Fp_full)
    Fp = _round_up(F, tf)

    # --- derive the row tile tm from the remaining VMEM ------------------
    per_row = (2 * Ep * x_isz        # x block (double-buffered)
               + 2 * Ep * x_isz      # out block (double-buffered)
               + Ep * 4              # f32 accumulator scratch
               + Ep * 2              # bf16 x scratch
               + tf * 4 + tf * 2)    # hidden intermediate (f32 + bf16 copy)
    fixed = (2 * Ep * tf * 2         # W1 chunk x 2 buffers (bf16)
             + 2 * tf * Ep * 2       # W2 chunk x 2 buffers (bf16)
             + 2 * 8 * Fp * 4        # b1 (resident, sublane-padded)
             + 2 * 8 * Ep * 4        # packed b2/gamma/beta
             + (4 << 20))            # compiler / misc headroom
    tm_cap = max((vmem_budget - fixed) // per_row, 8)
    tm = tile_m if tile_m is not None else 1024
    tm = max(min(tm, tm_cap, 1024), 8)
    if tm >= 256:
        tm = (tm // 256) * 256       # MXU-friendly on v6e/v7x
    else:
        tm = (tm // 8) * 8
    tm = max(min(tm, _round_up(N, 8)), 8)
    Np = _round_up(N, tm)

    # --- pad operands -----------------------------------------------------
    if Np != N or Ep != E:
        xf = jnp.pad(xf, ((0, Np - N), (0, Ep - E)))
    w1 = params["w1_t"].astype(jnp.bfloat16)                 # (E, F)
    w2 = params["w2_t"].astype(jnp.bfloat16)                 # (F, E)
    if Ep != E or Fp != F:
        w1 = jnp.pad(w1, ((0, Ep - E), (0, Fp - F)))
        w2 = jnp.pad(w2, ((0, Fp - F), (0, Ep - E)))
    b1 = jnp.pad(params["b1"].astype(jnp.float32), (0, Fp - F)).reshape(1, Fp)
    misc = jnp.stack([
        jnp.pad(params["b2"].reshape(E).astype(jnp.float32), (0, Ep - E)),
        jnp.pad(params["ln_g"].reshape(E).astype(jnp.float32), (0, Ep - E)),
        jnp.pad(params["ln_b"].reshape(E).astype(jnp.float32), (0, Ep - E)),
    ], axis=0)                                               # (3, Ep)

    grid = (Np // tm, Fp // tf)

    vmem_est = fixed + tm * per_row
    vmem_limit = max(vmem_est, 16 << 20)
    vmem_limit = min(vmem_limit, (vmem_cap * 9) // 10)

    cost = pl.CostEstimate(
        flops=4 * Np * Ep * Fp,
        transcendentals=0,
        bytes_accessed=(2 * Np * Ep * x_isz            # x in + out
                        + 2 * Ep * Fp * 2              # W1 + W2 (one pass)
                        + Fp * 4 + 3 * Ep * 4))

    kernel = functools.partial(_ffn_kernel, tf=tf, inv_e=1.0 / float(E))

    out = pl.pallas_call(
        kernel,
        out_shape=jax.ShapeDtypeStruct((Np, Ep), out_dtype),
        grid_spec=pltpu.PrefetchScalarGridSpec(
            num_scalar_prefetch=0,
            grid=grid,
            in_specs=[
                pl.BlockSpec((tm, Ep), lambda i, f: (i, 0)),   # x rows (resident over f)
                pl.BlockSpec((Ep, tf), lambda i, f: (0, f)),   # W1 hidden chunk
                pl.BlockSpec((1, Fp), lambda i, f: (0, 0)),    # b1 (fully resident)
                pl.BlockSpec((tf, Ep), lambda i, f: (f, 0)),   # W2 hidden chunk
                pl.BlockSpec((3, Ep), lambda i, f: (0, 0)),    # packed b2 / gamma / beta
            ],
            out_specs=pl.BlockSpec((tm, Ep), lambda i, f: (i, 0)),
            scratch_shapes=[
                pltpu.VMEM((tm, Ep), jnp.float32),             # accumulator
                pltpu.VMEM((tm, Ep), jnp.bfloat16),            # hoisted bf16 x
            ],
        ),
        compiler_params=pltpu.CompilerParams(
            dimension_semantics=("parallel", "arbitrary"),
            vmem_limit_bytes=int(vmem_limit)),
        cost_estimate=cost,
    )(xf, w1, b1, w2, misc)

    return out[:N, :E].reshape(orig_shape)


def init_params(key, emb_dim, fwd_dim):
    """Mimics PyTorch nn.Linear / nn.LayerNorm default init."""
    k1, k2, k3, k4 = jax.random.split(key, 4)
    bound1 = 1.0 / (emb_dim ** 0.5)
    bound2 = 1.0 / (fwd_dim ** 0.5)
    return {
        # stored pre-transposed: y = x @ W_t + b
        "w1_t": jax.random.uniform(k1, (emb_dim, fwd_dim), jnp.float32, -bound1, bound1),
        "b1":   jax.random.uniform(k2, (fwd_dim,), jnp.float32, -bound1, bound1),
        "w2_t": jax.random.uniform(k3, (fwd_dim, emb_dim), jnp.float32, -bound2, bound2),
        "b2":   jax.random.uniform(k4, (emb_dim,), jnp.float32, -bound2, bound2),
        "ln_g": jnp.ones((emb_dim,), jnp.float32),
        "ln_b": jnp.zeros((emb_dim,), jnp.float32),
    }


def ffn_reference(params, x):
    h = jnp.maximum(x @ params["w1_t"] + params["b1"], 0.0)
    z = h @ params["w2_t"] + params["b2"] + x
    mu = jnp.mean(z, axis=-1, keepdims=True)
    var = jnp.mean((z - mu) ** 2, axis=-1, keepdims=True)
    return (z - mu) * jax.lax.rsqrt(var + EPS) * params["ln_g"] + params["ln_b"]


if __name__ == "__main__":
    B, S, E, F = 2, 8, 32, 64
    key = jax.random.PRNGKey(0)
    pkey, xkey = jax.random.split(key)
    params = init_params(pkey, E, F)
    x = jax.random.normal(xkey, (B, S, E), jnp.float32)

    out = pointwise_feed_forward(params, x)
    out = jax.block_until_ready(out)
    assert out.shape == (B, S, E) and out.dtype == x.dtype

    ref = ffn_reference(params, x)
    err = float(jnp.max(jnp.abs(out.astype(jnp.float32) - ref)))
    assert err < 5e-2, f"max abs err {err}"
    print("KERNEL_OK")
</pallas_src>

<mosaic_0001>
module attributes {stable_mosaic.version = 11 : i64} {
  func.func @_ffn_kernel(%arg0: i32, %arg1: i32, %arg2: memref<16x128xf32, #tpu.memory_space<vmem>>, %arg3: memref<128x128xbf16, #tpu.memory_space<vmem>>, %arg4: memref<1x128xf32, #tpu.memory_space<vmem>>, %arg5: memref<128x128xbf16, #tpu.memory_space<vmem>>, %arg6: memref<3x128xf32, #tpu.memory_space<vmem>>, %arg7: memref<16x128xf32, #tpu.memory_space<vmem>>, %arg8: memref<16x128xf32, #tpu.memory_space<vmem>>, %arg9: memref<16x128xbf16, #tpu.memory_space<vmem>>) attributes {dimension_semantics = [#tpu.dimension_semantics<parallel>, #tpu.dimension_semantics<arbitrary>], iteration_bounds = array<i64: 1, 1>, scalar_prefetch = 0 : i64, scratch_operands = 2 : i64, tpu.core_type = #tpu.core_type<tc>, window_params = [{transform_indices = @transform_0, window_bounds = array<i64: 16, 128>}, {transform_indices = @transform_1, window_bounds = array<i64: 128, 128>}, {pipeline_mode = #tpu.pipeline_mode<synchronous>, transform_indices = @transform_2, window_bounds = array<i64: 1, 128>}, {transform_indices = @transform_3, window_bounds = array<i64: 128, 128>}, {pipeline_mode = #tpu.pipeline_mode<synchronous>, transform_indices = @transform_4, window_bounds = array<i64: 3, 128>}, {transform_indices = @transform_5, window_bounds = array<i64: 16, 128>}]} {
    %c0_i32 = arith.constant 0 : i32
    %0 = arith.cmpi eq, %arg1, %c0_i32 : i32
    %1 = arith.extui %0 : i1 to i32
    %c0_i32_0 = arith.constant 0 : i32
    %2 = arith.cmpi ne, %1, %c0_i32_0 : i32
    scf.if %2 {
      %cst_15 = arith.constant 0.000000e+00 : f32
      %23 = vector.broadcast %cst_15 : f32 to vector<16x128xf32>
      %c0_16 = arith.constant 0 : index
      %c0_17 = arith.constant 0 : index
      %24 = vector.load %arg8[%c0_16, %c0_17] : memref<16x128xf32, #tpu.memory_space<vmem>>, vector<16x128xf32>
      tpu.vector_store %arg8[%c0_16, %c0_17], %23 {strides = array<i32>} : memref<16x128xf32, #tpu.memory_space<vmem>>, vector<16x128xf32>,
      %c0_18 = arith.constant 0 : index
      %c0_19 = arith.constant 0 : index
      %25 = vector.load %arg2[%c0_18, %c0_19] : memref<16x128xf32, #tpu.memory_space<vmem>>, vector<16x128xf32>
      %26 = arith.truncf %25 : vector<16x128xf32> to vector<16x128xbf16>
      %c0_20 = arith.constant 0 : index
      %c0_21 = arith.constant 0 : index
      %27 = vector.load %arg9[%c0_20, %c0_21] : memref<16x128xbf16, #tpu.memory_space<vmem>>, vector<16x128xbf16>
      tpu.vector_store %arg9[%c0_20, %c0_21], %26 {strides = array<i32>} : memref<16x128xbf16, #tpu.memory_space<vmem>>, vector<16x128xbf16>,
    } else {
    }
    %c128_i32 = arith.constant 128 : i32
    %3 = arith.muli %arg1, %c128_i32 : i32
    %4 = tpu.assume_multiple %3, 128 : i32
    %c0 = arith.constant 0 : index
    %5 = arith.index_cast %4 : i32 to index
    %6 = vector.load %arg4[%c0, %5] : memref<1x128xf32, #tpu.memory_space<vmem>>, vector<1x128xf32>
    %c0_1 = arith.constant 0 : index
    %c0_2 = arith.constant 0 : index
    %7 = vector.load %arg9[%c0_1, %c0_2] : memref<16x128xbf16, #tpu.memory_space<vmem>>, vector<16x128xbf16>
    %c0_3 = arith.constant 0 : index
    %c0_4 = arith.constant 0 : index
    %8 = vector.load %arg3[%c0_3, %c0_4] : memref<128x128xbf16, #tpu.memory_space<vmem>>, vector<128x128xbf16>
    %cst = arith.constant dense<0.000000e+00> : vector<16x128xf32>
    %9 = tpu.matmul %7, %8, %cst {dimension_numbers = #tpu.dot_dimension_numbers<[1], [0], [0], [1], [0, 0, 1, 1], [], []>} : vector<16x128xbf16>, vector<128x128xbf16>, vector<16x128xf32> -> vector<16x128xf32>
    %10 = vector.broadcast %6 : vector<1x128xf32> to vector<16x128xf32>
    %11 = arith.addf %9, %10 : vector<16x128xf32>
    %cst_5 = arith.constant 0.000000e+00 : f32
    %12 = vector.broadcast %cst_5 : f32 to vector<16x128xf32>
    %13 = arith.maximumf %11, %12 : vector<16x128xf32>
    %c0_6 = arith.constant 0 : index
    %c0_7 = arith.constant 0 : index
    %14 = vector.load %arg8[%c0_6, %c0_7] : memref<16x128xf32, #tpu.memory_space<vmem>>, vector<16x128xf32>
    %15 = arith.truncf %13 : vector<16x128xf32> to vector<16x128xbf16>
    %c0_8 = arith.constant 0 : index
    %c0_9 = arith.constant 0 : index
    %16 = vector.load %arg5[%c0_8, %c0_9] : memref<128x128xbf16, #tpu.memory_space<vmem>>, vector<128x128xbf16>
    %cst_10 = arith.constant dense<0.000000e+00> : vector<16x128xf32>
    %17 = tpu.matmul %15, %16, %cst_10 {dimension_numbers = #tpu.dot_dimension_numbers<[1], [0], [0], [1], [0, 0, 1, 1], [], []>} : vector<16x128xbf16>, vector<128x128xbf16>, vector<16x128xf32> -> vector<16x128xf32>
    %18 = arith.addf %14, %17 : vector<16x128xf32>
    %c0_11 = arith.constant 0 : index
    %c0_12 = arith.constant 0 : index
    %19 = vector.load %arg8[%c0_11, %c0_12] : memref<16x128xf32, #tpu.memory_space<vmem>>, vector<16x128xf32>
    tpu.vector_store %arg8[%c0_11, %c0_12], %18 {strides = array<i32>} : memref<16x128xf32, #tpu.memory_space<vmem>>, vector<16x128xf32>,
    %c0_i32_13 = arith.constant 0 : i32
    %20 = arith.cmpi eq, %arg1, %c0_i32_13 : i32
    %21 = arith.extui %20 : i1 to i32
    %c0_i32_14 = arith.constant 0 : i32
    %22 = arith.cmpi ne, %21, %c0_i32_14 : i32
    scf.if %22 {
      %c0_15 = arith.constant 0 : index
      %c0_16 = arith.constant 0 : index
      %23 = vector.load %arg6[%c0_15, %c0_16] : memref<3x128xf32, #tpu.memory_space<vmem>>, vector<1x128xf32>
      %c1 = arith.constant 1 : index
      %c0_17 = arith.constant 0 : index
      %24 = vector.load %arg6[%c1, %c0_17] : memref<3x128xf32, #tpu.memory_space<vmem>>, vector<1x128xf32>
      %c2 = arith.constant 2 : index
      %c0_18 = arith.constant 0 : index
      %25 = vector.load %arg6[%c2, %c0_18] : memref<3x128xf32, #tpu.memory_space<vmem>>, vector<1x128xf32>
      %c0_19 = arith.constant 0 : index
      %c0_20 = arith.constant 0 : index
      %26 = vector.load %arg8[%c0_19, %c0_20] : memref<16x128xf32, #tpu.memory_space<vmem>>, vector<16x128xf32>
      %27 = vector.broadcast %23 : vector<1x128xf32> to vector<16x128xf32>
      %28 = arith.addf %26, %27 : vector<16x128xf32>
      %c0_21 = arith.constant 0 : index
      %c0_22 = arith.constant 0 : index
      %29 = vector.load %arg2[%c0_21, %c0_22] : memref<16x128xf32, #tpu.memory_space<vmem>>, vector<16x128xf32>
      %30 = arith.addf %28, %29 : vector<16x128xf32>
      %cst_23 = arith.constant dense<0.000000e+00> : vector<16xf32>
      %31 = vector.multi_reduction <add>, %30, %cst_23 [1] : vector<16x128xf32> to vector<16xf32>
      %32 = vector.shape_cast %31 : vector<16xf32> to vector<16x1xf32>
      %33 = arith.mulf %30, %30 : vector<16x128xf32>
      %cst_24 = arith.constant dense<0.000000e+00> : vector<16xf32>
      %34 = vector.multi_reduction <add>, %33, %cst_24 [1] : vector<16x128xf32> to vector<16xf32>
      %35 = vector.shape_cast %34 : vector<16xf32> to vector<16x1xf32>
      %cst_25 = arith.constant 3.125000e-02 : f32
      %36 = vector.broadcast %cst_25 : f32 to vector<16x1xf32>
      %37 = arith.mulf %32, %36 : vector<16x1xf32>
      %cst_26 = arith.constant 3.125000e-02 : f32
      %38 = vector.broadcast %cst_26 : f32 to vector<16x1xf32>
      %39 = arith.mulf %35, %38 : vector<16x1xf32>
      %40 = arith.mulf %37, %37 : vector<16x1xf32>
      %41 = arith.subf %39, %40 : vector<16x1xf32>
      %42 = vector.broadcast %37 : vector<16x1xf32> to vector<16x128xf32>
      %43 = arith.subf %30, %42 : vector<16x128xf32>
      %cst_27 = arith.constant 9.99999974E-6 : f32
      %44 = vector.broadcast %cst_27 : f32 to vector<16x1xf32>
      %45 = arith.addf %41, %44 : vector<16x1xf32>
      %46 = math.rsqrt %45 : vector<16x1xf32>
      %47 = vector.broadcast %46 : vector<16x1xf32> to vector<16x128xf32>
      %48 = arith.mulf %43, %47 : vector<16x128xf32>
      %49 = vector.broadcast %24 : vector<1x128xf32> to vector<16x128xf32>
      %50 = arith.mulf %48, %49 : vector<16x128xf32>
      %51 = vector.broadcast %25 : vector<1x128xf32> to vector<16x128xf32>
      %52 = arith.addf %50, %51 : vector<16x128xf32>
      %c0_28 = arith.constant 0 : index
      %c0_29 = arith.constant 0 : index
      %53 = vector.load %arg7[%c0_28, %c0_29] : memref<16x128xf32, #tpu.memory_space<vmem>>, vector<16x128xf32>
      tpu.vector_store %arg7[%c0_28, %c0_29], %52 {strides = array<i32>} : memref<16x128xf32, #tpu.memory_space<vmem>>, vector<16x128xf32>,
    } else {
    }
    return
  }
  func.func @transform_0(%arg0: i32, %arg1: i32) -> (i32, i32) {
    %c0_i32 = arith.constant 0 : i32
    %c0_i32_0 = arith.constant 0 : i32
    return %arg0, %c0_i32 : i32, i32
  }
  func.func @transform_1(%arg0: i32, %arg1: i32) -> (i32, i32) {
    %c0_i32 = arith.constant 0 : i32
    %c0_i32_0 = arith.constant 0 : i32
    return %c0_i32, %arg1 : i32, i32
  }
  func.func @transform_2(%arg0: i32, %arg1: i32) -> (i32, i32) {
    %c0_i32 = arith.constant 0 : i32
    %c0_i32_0 = arith.constant 0 : i32
    %c0_i32_1 = arith.constant 0 : i32
    return %c0_i32, %c0_i32_0 : i32, i32
  }
  func.func @transform_3(%arg0: i32, %arg1: i32) -> (i32, i32) {
    %c0_i32 = arith.constant 0 : i32
    %c0_i32_0 = arith.constant 0 : i32
    return %arg1, %c0_i32 : i32, i32
  }
  func.func @transform_4(%arg0: i32, %arg1: i32) -> (i32, i32) {
    %c0_i32 = arith.constant 0 : i32
    %c0_i32_0 = arith.constant 0 : i32
    %c0_i32_1 = arith.constant 0 : i32
    return %c0_i32, %c0_i32_0 : i32, i32
  }
  func.func @transform_5(%arg0: i32, %arg1: i32) -> (i32, i32) {
    %c0_i32 = arith.constant 0 : i32
    %c0_i32_0 = arith.constant 0 : i32
    return %arg0, %c0_i32 : i32, i32
  }
}

</mosaic_0001>

<bundles_post_ra>
// kernel: tpu_custom_call.1
= control target key start
LH: loop header
LB: loop body
LE: loop exit
PB: predicated region body
PF: predicated region fallthrough
CT: control target
= control target key end

     0   :  { %10 = vsyncpa [#allocation5], 0  ;;  %s695_s0 = inlined_call_operand.hbm [shape: f32[16,128], index: 0, kind: input, shape index: {}]   ;;  %s696_s1 = inlined_call_operand.hbm [shape: bf16[128,128], index: 1, kind: input, shape index: {}]   ;;  %s697_s2 = inlined_call_operand.vmem [shape: f32[1,128], index: 2, kind: input, shape index: {}]   ;;  %s698_s3 = inlined_call_operand.hbm [shape: bf16[128,128], index: 3, kind: input, shape index: {}]   ;;  %s699_s4 = inlined_call_operand.vmem [shape: f32[3,128], index: 4, kind: input, shape index: {}]   ;;  %s700_s5 = inlined_call_operand.hbm [shape: f32[16,128], index: 5, kind: output, shape index: {}]  }
   0x1   :  { %11 = vsyncpa [#allocation8], 0 }
   0x2   :  { %12 = vsyncpa [#allocation6], 0  ;;  %s583_s18 = smov [#allocation7]   ;;  %s489_s22 = scalar_lea.hbm %s696_s1, 1024 }
   0x3   :  { %s30_s19 = sshll.u32 %s583_s18, 4  ;;  %p490_p0 = scmp.ne.s32.totalorder %s696_s1, %s489_s22  ;;  %s31_s19 = int_to_ptr.vmem [resolvable:$true] %s30_s19 }
   0x4   :  { %p493_p1 = scmp.lt.u32.totalorder %s489_s22, %s696_s1 }
   0x6   :  { %p495_p2 = pnand %p493_p1, %p490_p0 }
   0x8   :  { %498 = shalt.err (!%p495_p2)
}
   0x9   :  { %s499_s27 = scalar_lea.vmem %s31_s19, 1024  ;;  %p504_p4 = scmp.lt.s32.totalorder %s31_s19, %s31_s19 }
   0xa   :  { %p500_p3 = scmp.ne.s32.totalorder %s31_s19, %s499_s27  ;;  %p505_p5 = scmp.lt.s32.totalorder %s499_s27, %s499_s27 }
   0xc   :  { %p506_p6 = por %p505_p5, %p504_p4 }
   0xe   :  { %p507_p7 = pnand %p506_p6, %p500_p3 }
  0x10   :  { %510 = shalt.err (!%p507_p7)
}
  0x11   :  { %s584_s28 = smov 64   ;;  %s585_s29 = smov 4  }
  0x12   :  { %36 = dma.hbm_to_vmem [thread:$0]  %s696_s1, 1024, %s31_s19, [#allocation8], %s584_s28, %s584_s28, %s585_s29  }
  0x13   :  { %s586_s7 = smov [#allocation4]   ;;  %s511_s11 = scalar_lea.hbm %s695_s0, 256 }
  0x14   :  { %s18_s8 = sshll.u32 %s586_s7, 4  ;;  %p512_p8 = scmp.ne.s32.totalorder %s695_s0, %s511_s11  ;;  %s19_s8 = int_to_ptr.vmem [resolvable:$true] %s18_s8 }
  0x15   :  { %p515_p9 = scmp.lt.u32.totalorder %s511_s11, %s695_s0 }
  0x17   :  { %p517_p10 = pnand %p515_p9, %p512_p8 }
  0x19   :  { %520 = shalt.err (!%p517_p10)
}
  0x1a   :  { %s521_s16 = scalar_lea.vmem %s19_s8, 256  ;;  %p526_p12 = scmp.lt.s32.totalorder %s19_s8, %s19_s8 }
  0x1b   :  { %p522_p11 = scmp.ne.s32.totalorder %s19_s8, %s521_s16  ;;  %p527_p13 = scmp.lt.s32.totalorder %s521_s16, %s521_s16 }
  0x1d   :  { %p528_p0 = por %p527_p13, %p526_p12 }
  0x1f   :  { %p529_p1 = pnand %p528_p0, %p522_p11 }
  0x21   :  { %532 = shalt.err (!%p529_p1)
}
  0x22   :  { %s587_s1 = smov 128   ;;  %s588_s17 = smov 8  }
  0x23   :  { %24 = dma.hbm_to_vmem [thread:$0]  %s695_s0, 256, %s19_s8, [#allocation5], %s587_s1, %s587_s1, %s588_s17  }
  0x24   :  { %s589_s20 = smov [#allocation9]   ;;  %s533_s24 = scalar_lea.hbm %s698_s3, 1024 }
  0x25   :  { %s44_s21 = sshll.u32 %s589_s20, 4  ;;  %p534_p2 = scmp.ne.s32.totalorder %s698_s3, %s533_s24  ;;  %s45_s21 = int_to_ptr.vmem [resolvable:$true] %s44_s21 }
  0x26   :  { %p537_p3 = scmp.lt.u32.totalorder %s533_s24, %s698_s3 }
  0x28   :  { %p539_p4 = pnand %p537_p3, %p534_p2 }
  0x2a   :  { %542 = shalt.err (!%p539_p4)
}
  0x2b   :  { %s543_s6 = scalar_lea.vmem %s45_s21, 1024  ;;  %p548_p6 = scmp.lt.s32.totalorder %s45_s21, %s45_s21 }
  0x2c   :  { %p544_p5 = scmp.ne.s32.totalorder %s45_s21, %s543_s6  ;;  %p549_p7 = scmp.lt.s32.totalorder %s543_s6, %s543_s6 }
  0x2e   :  { %p550_p8 = por %p549_p7, %p548_p6 }
  0x30   :  { %p551_p9 = pnand %p550_p8, %p544_p5 }
  0x32   :  { %554 = shalt.err (!%p551_p9)
}
  0x33   :  { %50 = dma.hbm_to_vmem [thread:$0]  %s698_s3, 1024, %s45_s21, [#allocation8], %s584_s28, %s584_s28, %s585_s29  }
  0x34   :  { %577 = dma.done.wait [#allocation5], 256  }
  0x35   :  { %578 = vsyncadd [#allocation5], 4294967040 }
  0x36   :  { %579 = dma.done.wait [#allocation8], 2048  }
  0x37   :  { %580 = vsyncadd [#allocation8], 4294965248  ;;  %v590_v0 = vmov 0.0   ;;  %vm591_vm0 = vmmov 0   ;;  %v469_v1 = vld [vmem:[#allocation7] sm:$0xff]   ;;  %v470_v2 = vld [vmem:[#allocation7 + $0x8] sm:$0xff]  }
  0x38   :  { %419 = vmatprep.subr.bf16.mxu0 %v590_v0  ;;  %435 = vmatprep.mubr.msk.bf16.mxu0 %vm591_vm0, %v590_v0  ;;  %v471_v3 = vld [vmem:[#allocation7 + $0x10] sm:$0xff]   ;;  %v477_v4 = vld [vmem:[#allocation9] sm:$0xff]   ;;  %v472_v5 = vld [vmem:[#allocation7 + $0x18] sm:$0xff]   ;;  %s592_s12 = smov [#allocation10]  }
  0x39   :  { %439 = vmatprep.subr.bf16.mxu1 %v590_v0  ;;  %455 = vmatprep.mubr.msk.bf16.mxu1 %vm591_vm0, %v590_v0  ;;  %v478_v6 = vld [vmem:[#allocation9 + $0x8] sm:$0xff]   ;;  %v473_v7 = vld [vmem:[#allocation7 + $0x20] sm:$0xff]   ;;  %v479_v8 = vld [vmem:[#allocation9 + $0x10] sm:$0xff]   ;;  %s367_s13 = sshll.u32 %s592_s12, 4  ;;  %s368_s13 = int_to_ptr.vmem [resolvable:$true] %s367_s13 }
  0x3a   :  { %420 = vmatpush3.bf16.msra.mxu0 %v469_v1  ;;  %440 = vmatpush3.bf16.msra.mxu1 %v477_v4  ;;  %v474_v9 = vld [vmem:[#allocation7 + $0x28] sm:$0xff]   ;;  %v480_v10 = vld [vmem:[#allocation9 + $0x18] sm:$0xff]   ;;  %v475_v11 = vld [vmem:[#allocation7 + $0x30] sm:$0xff]   ;;  %s555_s14 = scalar_lea.vmem %s368_s13, 256  ;;  %p560_p11 = scmp.lt.s32.totalorder %s368_s13, %s368_s13 }
  0x3b   :  { %421 = vmatprep.subr.bf16.mxu0 %v590_v0  ;;  %441 = vmatprep.subr.bf16.mxu1 %v590_v0  ;;  %v481_v12 = vld [vmem:[#allocation9 + $0x20] sm:$0xff]   ;;  %v476_v13 = vld [vmem:[#allocation7 + $0x38] sm:$0xff]   ;;  %v69_v14 = vld [vmem:[#allocation4] sm:$0xff]  ;;  %p556_p10 = scmp.ne.s32.totalorder %s368_s13, %s555_s14  ;;  %p561_p12 = scmp.lt.s32.totalorder %s555_s14, %s555_s14 }
  0x3c   :  { %v70_v15 = vld [vmem:[#allocation4 + $0x8] sm:$0xff]  ;;  %v482_v16 = vld [vmem:[#allocation9 + $0x28] sm:$0xff]   ;;  %v483_v18 = vld [vmem:[#allocation9 + $0x30] sm:$0xff]  }
  0x3d   :  { %v71_v17 = vpack.c.bf16 %v70_v15, %v69_v14  ;;  %v484_v19 = vld [vmem:[#allocation9 + $0x38] sm:$0xff]   ;;  %v381_v20 = vld [vmem:[%s697_s2] ss:$0 sm:$0xff]  ;;  %v399_v57 = vld [vmem:[%s699_s4 + $0x1] ss:$0 sm:$0xff]  ;;  %p562_p13 = por %p561_p12, %p560_p11 }
  0x3e   :  { %422 = vmatpush3.bf16.msra.mxu0 %v470_v2  ;;  %442 = vmatpush3.bf16.msra.mxu1 %v478_v6  ;;  %v398_v30 = vld [vmem:[%s699_s4] ss:$0 sm:$0xff]  ;;  %v400_v59 = vld [vmem:[%s699_s4 + $0x2] ss:$0 sm:$0xff] }
  0x3f   :  { %423 = vmatprep.subr.bf16.mxu0 %v590_v0  ;;  %443 = vmatprep.subr.bf16.mxu1 %v590_v0  ;;  %p563_p0 = pnand %p562_p13, %p556_p10 }
  0x42   :  { %424 = vmatpush3.bf16.msra.mxu0 %v471_v3  ;;  %444 = vmatpush3.bf16.msra.mxu1 %v479_v8 }
  0x43   :  { %425 = vmatprep.subr.bf16.mxu0 %v590_v0  ;;  %445 = vmatprep.subr.bf16.mxu1 %v590_v0 }
  0x46   :  { %426 = vmatpush3.bf16.msra.mxu0 %v472_v5  ;;  %446 = vmatpush3.bf16.msra.mxu1 %v480_v10 }
  0x47   :  { %427 = vmatprep.subr.bf16.mxu0 %v590_v0  ;;  %447 = vmatprep.subr.bf16.mxu1 %v590_v0 }
  0x4a   :  { %428 = vmatpush3.bf16.msra.mxu0 %v473_v7  ;;  %448 = vmatpush3.bf16.msra.mxu1 %v481_v12 }
  0x4b   :  { %429 = vmatprep.subr.bf16.mxu0 %v590_v0  ;;  %449 = vmatprep.subr.bf16.mxu1 %v590_v0 }
  0x4e   :  { %430 = vmatpush3.bf16.msra.mxu0 %v474_v9  ;;  %450 = vmatpush3.bf16.msra.mxu1 %v482_v16 }
  0x4f   :  { %431 = vmatprep.subr.bf16.mxu0 %v590_v0  ;;  %451 = vmatprep.subr.bf16.mxu1 %v590_v0 }
  0x52   :  { %432 = vmatpush3.bf16.msra.mxu0 %v475_v11  ;;  %452 = vmatpush3.bf16.msra.mxu1 %v483_v18 }
  0x53   :  { %433 = vmatprep.subr.bf16.mxu0 %v590_v0  ;;  %453 = vmatprep.subr.bf16.mxu1 %v590_v0 }
  0x56   :  { %434 = vmatpush3.bf16.msra.mxu0 %v476_v13  ;;  %454 = vmatpush3.bf16.msra.mxu1 %v484_v19 }
  0x59   :  { %436 = vmatmul.mubr.bf16.vlgmr.msra.gmra.mrb[0].mxu0 %v71_v17 }
 0x12c   :  { %v183_v21 = vpop.f32.mrb[0].mxu0 }
 0x12d   :  { %v184_v22 = vadd.f32 %v381_v20, %v183_v21  ;;  %v437_v23 = vpop.f32.mrb[1].mxu0 }
 0x12e   :  { %v186_v24 = vpop.f32.mrb[2].mxu0 }
 0x12f   :  { %v187_v25 = vadd.f32 %v381_v20, %v186_v24  ;;  %v438_v26 = vpop.f32.mrb[3].mxu0  ;;  %v190_v27 = vmax.f32 %v184_v22, 0.0 }
 0x131   :  { %v191_v28 = vmax.f32 %v187_v25, 0.0 }
 0x133   :  { %v194_v29 = vpack.c.bf16 %v191_v28, %v190_v27 }
 0x135   :  { %456 = vmatmul.mubr.bf16.vlgmr.msra.gmra.mrb[0].mxu1 %v194_v29 }
 0x208   :  { %v293_v31 = vpop.f32.mrb[0].mxu1 }
 0x209   :  { %v316_v32 = vadd.f32 %v398_v30, %v293_v31  ;;  %v457_v33 = vpop.f32.mrb[1].mxu1 }
 0x20a   :  { %v296_v34 = vpop.f32.mrb[2].mxu1 }
 0x20b   :  { %v320_v35 = vadd.f32 %v316_v32, %v69_v14  ;;  %v317_v36 = vadd.f32 %v398_v30, %v296_v34  ;;  %v458_v37 = vpop.f32.mrb[3].mxu1 }
 0x20d   :  { %v321_v38 = vadd.f32 %v317_v36, %v70_v15  ;;  %322 = vadd.xlane.f32.xlu0 %v320_v35  ;;  %v326_v39 = vmul.f32 %v320_v35, %v320_v35 }
 0x20f   :  { %328 = vadd.xlane.f32.xlu1 %v326_v39  ;;  %v327_v40 = vmul.f32 %v321_v38, %v321_v38 }
 0x211   :  { %324 = vadd.xlane.f32.xlu0 %v321_v38 }
 0x213   :  { %330 = vadd.xlane.f32.xlu1 %v327_v40 }
 0x29a   :  { %v323_v41 = vpop.xlane.xlu0 %322 }
 0x29b   :  { %v332_v42 = vmul.f32 0.03125, %v323_v41 }
 0x29c   :  { %v329_v43 = vpop.xlane.xlu1 %328 }
 0x29d   :  { %v336_v44 = vmul.f32 %v332_v42, %v332_v42  ;;  %v334_v45 = vmul.f32 0.03125, %v329_v43  ;;  %v340_v55 = vsub.f32 %v320_v35, %v332_v42 }
 0x29e   :  { %v325_v46 = vpop.xlane.xlu0 %324 }
 0x29f   :  { %v338_v47 = vsub.f32 %v334_v45, %v336_v44  ;;  %v333_v48 = vmul.f32 0.03125, %v325_v46 }
 0x2a0   :  { %v331_v49 = vpop.xlane.xlu1 %330 }
 0x2a1   :  { %v342_v50 = vadd.f32 1e-05, %v338_v47  ;;  %v337_v51 = vmul.f32 %v333_v48, %v333_v48  ;;  %v335_v52 = vmul.f32 0.03125, %v331_v49  ;;  %v341_v60 = vsub.f32 %v321_v38, %v333_v48 }
 0x2a3   :  { %485 = vrsqrt.f32 %v342_v50  ;;  %v339_v53 = vsub.f32 %v335_v52, %v337_v51 }
 0x2a5   :  { %v343_v54 = vadd.f32 1e-05, %v339_v53 }
 0x2a7   :  { %487 = vrsqrt.f32 %v343_v54 }
 0x2ad   :  { %v486_v56 = vpop.eup %485 }
 0x2ae   :  { %v346_v58 = vmul.f32 %v486_v56, %v340_v55 }
 0x2b0   :  { %v352_v61 = vmul.f32 %v399_v57, %v346_v58 }
 0x2b1   :  { %v488_v62 = vpop.eup %487 }
 0x2b2   :  { %v347_v63 = vmul.f32 %v488_v62, %v341_v60  ;;  %v358_v0 = vadd.f32 %v400_v59, %v352_v61 }
 0x2b4   :  { %v353_v1 = vmul.f32 %v399_v57, %v347_v63  ;;  %360 = vst [vmem:[#allocation10] sm:$0xff] %v358_v0 }
 0x2b6   :  { %v359_v2 = vadd.f32 %v400_v59, %v353_v1 }
 0x2b8   :  { %361 = vst [vmem:[#allocation10 + $0x8] sm:$0xff] %v359_v2 }
 0x2b9   :  { %566 = shalt.err (!%p563_p0)
}
 0x2ba   :  { %s567_s16 = scalar_lea.hbm %s700_s5, 256 }
 0x2bb   :  { %p568_p1 = scmp.ne.s32.totalorder %s700_s5, %s567_s16  ;;  %p571_p2 = scmp.lt.u32.totalorder %s567_s16, %s700_s5 }
 0x2bd   :  { %p573_p3 = pnand %p571_p2, %p568_p1 }
 0x2bf   :  { %576 = shalt.err (!%p573_p3)
}
 0x2c0   :  { %373 = dma.vmem_to_hbm [thread:$0]  %s368_s13, 256, %s700_s5, [#allocation6], %s587_s1, %s587_s1, %s588_s17  }
 0x2c1   :  { %581 = dma.done.wait [#allocation6], 256  }
 0x2c2   :  { %582 = vsyncadd [#allocation6], 4294967040 }
 0x2c3   :  { %377 = vsyncpa [#allocation5], 1 }
 0x2c4   :  { %378 = vsyncpa [#allocation8], 1 }
 0x2c5   :  { %379 = vsyncpa [#allocation6], 1 }

</bundles_post_ra>
